<compile_context>
chip_gen: v5e
topology: v5e:2x2
jax: 0.10.0
libtpu: 0.0.40
codegen_flags: <defaults>
</compile_context>

<pallas_src>
import jax
import jax.numpy as jnp
from jax import lax
from jax.experimental import pallas as pl
from jax.experimental.pallas import tpu as pltpu


def mapping_kernel(x_ref, wt_ref, o_ref, acc_ref, ssq_ref):
    """One (tm, tn) output tile, accumulated over the K grid axis.

    x_ref  : (tm, tk)  input tile
    wt_ref : (tk, tn)  transposed weight tile (bf16, streamed)
    o_ref  : (tm, tn)  output tile
    acc_ref: (tm, tn)  f32 matmul accumulator (scratch, persists across K steps)
    ssq_ref: (tm, 1)   f32 per-row sum-of-squares accumulator (scratch)
    """
    k = pl.program_id(2)

    @pl.when(k == 0)
    def _init():
        acc_ref[...] = jnp.zeros_like(acc_ref)
        ssq_ref[...] = jnp.zeros_like(ssq_ref)

    x = x_ref[...].astype(jnp.float32)
    # Per-row ||x||^2 accumulated over K tiles (VPU/XLU work, hidden under the MXU).
    ssq_ref[...] += jnp.sum(x * x, axis=-1, keepdims=True)
    # bf16 MXU matmul, f32 accumulation.
    acc_ref[...] += jnp.dot(
        x.astype(jnp.bfloat16),
        wt_ref[...].astype(jnp.bfloat16),
        preferred_element_type=jnp.float32,
    )

    @pl.when(k == pl.num_programs(2) - 1)
    def _finalize():
        # F.normalize eps: x / max(||x||, 1e-12) == x * rsqrt(max(||x||^2, 1e-24)).
        inv_norm = lax.rsqrt(jnp.maximum(ssq_ref[...], 1e-24))
        o_ref[...] = (acc_ref[...] * inv_norm).astype(o_ref.dtype)


def _pick_tile(dim, target, align):
    """Largest `align`-multiple divisor of `dim` that is <= target, else full dim."""
    if dim <= target:
        return dim
    start = target - (target % align)
    for t in range(start, 0, -align):
        if dim % t == 0:
            return t
    return dim


def prepare_mapping_weight(weight):
    """One-time prep (outside the per-call hot path):
    nn.Linear weight (out, in) -> (in, out), cast to bf16 for streaming."""
    return jnp.asarray(weight).T.astype(jnp.bfloat16)


def mapping_forward(x, wt, *, tm_target=256, tn_target=512, tk_target=512):
    """x: (B, C_in) float; wt: (C_in, C_out) pre-transposed weight
    (use prepare_mapping_weight once at init)."""
    B, C = x.shape
    Cin, Cout = wt.shape
    assert Cin == C, f"weight/input feature mismatch: {Cin} vs {C}"

    tm = _pick_tile(B, tm_target, 8)       # sublane dim of x / out (f32)
    tk = _pick_tile(C, tk_target, 128)     # lane dim of x, sublane dim of wt
    tn = _pick_tile(Cout, tn_target, 128)  # lane dim of wt / out
    grid = (B // tm, Cout // tn, C // tk)

    cost = pl.CostEstimate(
        flops=2 * B * C * Cout + 2 * B * C,
        transcendentals=B,
        bytes_accessed=(x.size * x.dtype.itemsize
                        + grid[0] * wt.size * wt.dtype.itemsize
                        + B * Cout * x.dtype.itemsize),
    )

    return pl.pallas_call(
        mapping_kernel,
        out_shape=jax.ShapeDtypeStruct((B, Cout), x.dtype),
        grid_spec=pltpu.PrefetchScalarGridSpec(
            num_scalar_prefetch=0,
            grid=grid,
            in_specs=[
                pl.BlockSpec((tm, tk), lambda i, j, k: (i, k)),   # x tile
                pl.BlockSpec((tk, tn), lambda i, j, k: (k, j)),   # weight tile (streamed)
            ],
            out_specs=pl.BlockSpec((tm, tn), lambda i, j, k: (i, j)),
            scratch_shapes=[
                pltpu.VMEM((tm, tn), jnp.float32),   # matmul accumulator
                pltpu.VMEM((tm, 1), jnp.float32),    # per-row sum of squares
            ],
        ),
        compiler_params=pltpu.CompilerParams(
            dimension_semantics=("parallel", "parallel", "arbitrary")),
        cost_estimate=cost,
    )(x, wt)


def mapping_reference(x, weight):
    """Pure-JAX (f32) reference mirroring the PyTorch module."""
    norm = jnp.sqrt(jnp.sum(x * x, axis=1, keepdims=True))
    x_norm = x / jnp.maximum(norm, 1e-12)
    return x_norm @ weight.T


if __name__ == "__main__":
    # Small shapes consistent with the module (inc defaults to 4096; use 256 here).
    B, C = 8, 256
    key = jax.random.PRNGKey(0)
    kx, kw = jax.random.split(key)
    x = jax.random.normal(kx, (B, C), dtype=jnp.float32)
    # Deterministic synthetic weight for nn.Linear(C, C, bias=False): shape (out, in).
    weight = (jax.random.normal(kw, (C, C), dtype=jnp.float32)
              * (1.0 / jnp.sqrt(C)))

    # One-time weight prep (transpose + bf16 cast) — hoisted out of the hot path.
    wt = prepare_mapping_weight(weight)

    ref = mapping_reference(x, weight)

    # Default tile plan (single tile at this small size).
    out = jax.block_until_ready(mapping_forward(x, wt))
    assert out.shape == (B, C)
    assert jnp.allclose(out, ref, atol=1e-2, rtol=1e-2), "mismatch vs reference (default tiles)"

    # Force small tiles to exercise the streamed K/N accumulation path on-device.
    out_tiled = jax.block_until_ready(
        mapping_forward(x, wt, tm_target=8, tn_target=128, tk_target=128))
    assert out_tiled.shape == (B, C)
    assert jnp.allclose(out_tiled, ref, atol=1e-2, rtol=1e-2), "mismatch vs reference (tiled)"

    print("KERNEL_OK")
</pallas_src>

<mosaic_0001>
module attributes {stable_mosaic.version = 11 : i64} {
  func.func @mapping_kernel(%arg0: i32, %arg1: i32, %arg2: i32, %arg3: memref<8x256xf32, #tpu.memory_space<vmem>>, %arg4: memref<256x256xbf16, #tpu.memory_space<vmem>>, %arg5: memref<8x256xf32, #tpu.memory_space<vmem>>, %arg6: memref<8x256xf32, #tpu.memory_space<vmem>>, %arg7: memref<8x1xf32, #tpu.memory_space<vmem>>) attributes {dimension_semantics = [#tpu.dimension_semantics<parallel>, #tpu.dimension_semantics<parallel>, #tpu.dimension_semantics<arbitrary>], iteration_bounds = array<i64: 1, 1, 1>, scalar_prefetch = 0 : i64, scratch_operands = 2 : i64, tpu.core_type = #tpu.core_type<tc>, window_params = [{transform_indices = @transform_0, window_bounds = array<i64: 8, 256>}, {transform_indices = @transform_1, window_bounds = array<i64: 256, 256>}, {transform_indices = @transform_2, window_bounds = array<i64: 8, 256>}]} {
    %c0_i32 = arith.constant 0 : i32
    %0 = arith.cmpi eq, %arg2, %c0_i32 : i32
    %1 = arith.extui %0 : i1 to i32
    %c0_i32_0 = arith.constant 0 : i32
    %2 = arith.cmpi ne, %1, %c0_i32_0 : i32
    scf.if %2 {
      %cst_15 = arith.constant 0.000000e+00 : f32
      %19 = vector.broadcast %cst_15 : f32 to vector<8x256xf32>
      %c0_16 = arith.constant 0 : index
      %c0_17 = arith.constant 0 : index
      %20 = vector.load %arg6[%c0_16, %c0_17] : memref<8x256xf32, #tpu.memory_space<vmem>>, vector<8x256xf32>
      tpu.vector_store %arg6[%c0_16, %c0_17], %19 {strides = array<i32>} : memref<8x256xf32, #tpu.memory_space<vmem>>, vector<8x256xf32>,
      %cst_18 = arith.constant 0.000000e+00 : f32
      %21 = vector.broadcast %cst_18 : f32 to vector<8x1xf32>
      %c0_19 = arith.constant 0 : index
      %c0_20 = arith.constant 0 : index
      %22 = vector.load %arg7[%c0_19, %c0_20] : memref<8x1xf32, #tpu.memory_space<vmem>>, vector<8x1xf32>
      tpu.vector_store %arg7[%c0_19, %c0_20], %21 {strides = array<i32>} : memref<8x1xf32, #tpu.memory_space<vmem>>, vector<8x1xf32>,
    } else {
    }
    %c0 = arith.constant 0 : index
    %c0_1 = arith.constant 0 : index
    %3 = vector.load %arg3[%c0, %c0_1] : memref<8x256xf32, #tpu.memory_space<vmem>>, vector<8x256xf32>
    %c0_2 = arith.constant 0 : index
    %c0_3 = arith.constant 0 : index
    %4 = vector.load %arg7[%c0_2, %c0_3] : memref<8x1xf32, #tpu.memory_space<vmem>>, vector<8x1xf32>
    %5 = arith.mulf %3, %3 : vector<8x256xf32>
    %cst = arith.constant dense<0.000000e+00> : vector<8xf32>
    %6 = vector.multi_reduction <add>, %5, %cst [1] : vector<8x256xf32> to vector<8xf32>
    %7 = vector.shape_cast %6 : vector<8xf32> to vector<8x1xf32>
    %8 = arith.addf %4, %7 : vector<8x1xf32>
    %c0_4 = arith.constant 0 : index
    %c0_5 = arith.constant 0 : index
    %9 = vector.load %arg7[%c0_4, %c0_5] : memref<8x1xf32, #tpu.memory_space<vmem>>, vector<8x1xf32>
    tpu.vector_store %arg7[%c0_4, %c0_5], %8 {strides = array<i32>} : memref<8x1xf32, #tpu.memory_space<vmem>>, vector<8x1xf32>,
    %c0_6 = arith.constant 0 : index
    %c0_7 = arith.constant 0 : index
    %10 = vector.load %arg6[%c0_6, %c0_7] : memref<8x256xf32, #tpu.memory_space<vmem>>, vector<8x256xf32>
    %11 = arith.truncf %3 : vector<8x256xf32> to vector<8x256xbf16>
    %c0_8 = arith.constant 0 : index
    %c0_9 = arith.constant 0 : index
    %12 = vector.load %arg4[%c0_8, %c0_9] : memref<256x256xbf16, #tpu.memory_space<vmem>>, vector<256x256xbf16>
    %cst_10 = arith.constant dense<0.000000e+00> : vector<8x256xf32>
    %13 = tpu.matmul %11, %12, %cst_10 {dimension_numbers = #tpu.dot_dimension_numbers<[1], [0], [0], [1], [0, 0, 1, 1], [], []>} : vector<8x256xbf16>, vector<256x256xbf16>, vector<8x256xf32> -> vector<8x256xf32>
    %14 = arith.addf %10, %13 : vector<8x256xf32>
    %c0_11 = arith.constant 0 : index
    %c0_12 = arith.constant 0 : index
    %15 = vector.load %arg6[%c0_11, %c0_12] : memref<8x256xf32, #tpu.memory_space<vmem>>, vector<8x256xf32>
    tpu.vector_store %arg6[%c0_11, %c0_12], %14 {strides = array<i32>} : memref<8x256xf32, #tpu.memory_space<vmem>>, vector<8x256xf32>,
    %c0_i32_13 = arith.constant 0 : i32
    %16 = arith.cmpi eq, %arg2, %c0_i32_13 : i32
    %17 = arith.extui %16 : i1 to i32
    %c0_i32_14 = arith.constant 0 : i32
    %18 = arith.cmpi ne, %17, %c0_i32_14 : i32
    scf.if %18 {
      %c0_15 = arith.constant 0 : index
      %c0_16 = arith.constant 0 : index
      %19 = vector.load %arg7[%c0_15, %c0_16] : memref<8x1xf32, #tpu.memory_space<vmem>>, vector<8x1xf32>
      %cst_17 = arith.constant 1.000000e-24 : f32
      %20 = vector.broadcast %cst_17 : f32 to vector<8x1xf32>
      %21 = arith.maximumf %19, %20 : vector<8x1xf32>
      %22 = math.rsqrt %21 : vector<8x1xf32>
      %c0_18 = arith.constant 0 : index
      %c0_19 = arith.constant 0 : index
      %23 = vector.load %arg6[%c0_18, %c0_19] : memref<8x256xf32, #tpu.memory_space<vmem>>, vector<8x256xf32>
      %24 = vector.broadcast %22 : vector<8x1xf32> to vector<8x256xf32>
      %25 = arith.mulf %23, %24 : vector<8x256xf32>
      %c0_20 = arith.constant 0 : index
      %c0_21 = arith.constant 0 : index
      %26 = vector.load %arg5[%c0_20, %c0_21] : memref<8x256xf32, #tpu.memory_space<vmem>>, vector<8x256xf32>
      tpu.vector_store %arg5[%c0_20, %c0_21], %25 {strides = array<i32>} : memref<8x256xf32, #tpu.memory_space<vmem>>, vector<8x256xf32>,
    } else {
    }
    return
  }
  func.func @transform_0(%arg0: i32, %arg1: i32, %arg2: i32) -> (i32, i32) {
    %c0_i32 = arith.constant 0 : i32
    return %arg0, %arg2 : i32, i32
  }
  func.func @transform_1(%arg0: i32, %arg1: i32, %arg2: i32) -> (i32, i32) {
    %c0_i32 = arith.constant 0 : i32
    return %arg2, %arg1 : i32, i32
  }
  func.func @transform_2(%arg0: i32, %arg1: i32, %arg2: i32) -> (i32, i32) {
    %c0_i32 = arith.constant 0 : i32
    return %arg0, %arg1 : i32, i32
  }
}

</mosaic_0001>

<bundles_post_ra>
// kernel: tpu_custom_call.1
= control target key start
LH: loop header
LB: loop body
LE: loop exit
PB: predicated region body
PF: predicated region fallthrough
CT: control target
= control target key end

     0   :  { %7 = vsyncpa [#allocation5], 0  ;;  %s650_s0 = inlined_call_operand.hbm [shape: f32[8,256], index: 0, kind: input, shape index: {}]   ;;  %s651_s1 = inlined_call_operand.hbm [shape: bf16[256,256], index: 1, kind: input, shape index: {}]   ;;  %s652_s2 = inlined_call_operand.hbm [shape: f32[8,256], index: 2, kind: output, shape index: {}]  }
   0x1   :  { %8 = vsyncpa [#allocation8], 0 }
   0x2   :  { %9 = vsyncpa [#allocation6], 0  ;;  %s15_s11 = sshll.u32 %s650_s0, 4  ;;  %s605_s12 = smov [#allocation4]   ;;  %s16_s11 = int_to_ptr.hbm [resolvable:$true] %s15_s11 }
   0x3   :  { %s17_s13 = sshll.u32 %s605_s12, 4  ;;  %s25_s16 = sshll.u32 %s651_s1, 4  ;;  %s18_s13 = int_to_ptr.vmem [resolvable:$true] %s17_s13  ;;  %s26_s16 = int_to_ptr.hbm [resolvable:$true] %s25_s16 }
   0x4   :  { %20 = dma.hbm_to_vmem [thread:$0]  %s16_s11, 256, %s18_s13, [#allocation5]  }
   0x5   :  { %s606_s17 = smov [#allocation7]   ;;  %s607_s19 = smov 128  }
   0x6   :  { %s27_s18 = sshll.u32 %s606_s17, 4  ;;  %s608_s20 = smov 8   ;;  %s28_s18 = int_to_ptr.vmem [resolvable:$true] %s27_s18 }
   0x7   :  { %33 = dma.hbm_to_vmem [thread:$0]  %s26_s16, 4096, %s28_s18, [#allocation8], %s607_s19, %s607_s19, %s608_s20  }
   0x8   :  { %599 = dma.done.wait [#allocation5], 256  }
   0x9   :  { %600 = vsyncadd [#allocation5], 4294967040 }
   0xa   :  { %601 = dma.done.wait [#allocation8], 4096  }
   0xb   :  { %602 = vsyncadd [#allocation8], 4294963200  ;;  %v633_v0 = vld [vmem:[#allocation4] sm:$0xff]  ;;  %v635_v1 = vld [vmem:[#allocation4 + $0x8] sm:$0xff]  ;;  %vm48_vm0 = vcmask 7168   ;;  %s611_s0 = smov [#allocation9]  }
   0xc   :  { %v499_v2 = vld [vmem:[#allocation7 + $0x74] sm:$0xf]  ;;  %v53_v3 = vmul.f32 %v633_v0, %v633_v0  ;;  %v54_v4 = vmul.f32 %v635_v1, %v635_v1  ;;  %v417_v5 = vld [vmem:[#allocation7 + $0x78] sm:$0xf0]  ;;  %v497_v10 = vld [vmem:[#allocation7 + $0x64] sm:$0xf] }
   0xd   :  { %v515_v6 = vld [vmem:[#allocation7 + $0xf4] sm:$0xf]  ;;  %v481_v7 = vld [vmem:[#allocation7 + $0xf8] sm:$0xf0]  ;;  %v420_v8 = vor.u32 %v499_v2, %v417_v5  ;;  %v409_v11 = vld [vmem:[#allocation7 + $0x68] sm:$0xf0] }
   0xe   :  { %v484_v9 = vor.u32 %v515_v6, %v481_v7  ;;  %v513_v12 = vld [vmem:[#allocation7 + $0xe4] sm:$0xf]  ;;  %v55_v13 = vadd.f32 %v54_v4, %v53_v3  ;;  %v473_v14 = vld [vmem:[#allocation7 + $0xe8] sm:$0xf0]  ;;  %v415_v15 = vld [vmem:[#allocation7 + $0x70] sm:$0xf]  ;;  %v412_v17 = vor.u32 %v497_v10, %v409_v11 }
   0xf   :  { %v500_v16 = vld [vmem:[#allocation7 + $0x74] sm:$0xf0]  ;;  %283 = vmatpush.bf16.msra.mxu2 %v420_v8  ;;  %v476_v18 = vor.u32 %v513_v12, %v473_v14  ;;  %v479_v20 = vld [vmem:[#allocation7 + $0xf0] sm:$0xf]  ;;  %v495_v22 = vld [vmem:[#allocation7 + $0x54] sm:$0xf] }
  0x10   :  { %296 = vmatpush.bf16.msra.mxu3 %v484_v9  ;;  %v416_v19 = vor.u32 %v500_v16, %v415_v15  ;;  %v516_v21 = vld [vmem:[#allocation7 + $0xf4] sm:$0xf0]  ;;  %56 = vadd.xlane.f32.xlu0 %v55_v13  ;;  %v401_v24 = vld [vmem:[#allocation7 + $0x58] sm:$0xf0]  ;;  %v511_v25 = vld [vmem:[#allocation7 + $0xd4] sm:$0xf] }
  0x11   :  { %v480_v23 = vor.u32 %v516_v21, %v479_v20  ;;  %v465_v26 = vld [vmem:[#allocation7 + $0xd8] sm:$0xf0]  ;;  %v407_v27 = vld [vmem:[#allocation7 + $0x60] sm:$0xf]  ;;  %v498_v28 = vld [vmem:[#allocation7 + $0x64] sm:$0xf0]  ;;  %v404_v34 = vor.u32 %v495_v22, %v401_v24 }
  0x12   :  { %257 = vmatpush.bf16.msra.mxu0 %v416_v19  ;;  %v471_v29 = vld [vmem:[#allocation7 + $0xe0] sm:$0xf]  ;;  %v408_v30 = vor.u32 %v498_v28, %v407_v27  ;;  %v514_v31 = vld [vmem:[#allocation7 + $0xe4] sm:$0xf0]  ;;  %v493_v32 = vld [vmem:[#allocation7 + $0x44] sm:$0xf]  ;;  %v468_v35 = vor.u32 %v511_v25, %v465_v26 }
  0x13   :  { %270 = vmatpush.bf16.msra.mxu1 %v480_v23  ;;  %v393_v33 = vld [vmem:[#allocation7 + $0x48] sm:$0xf0]  ;;  %284 = vmatpush.bf16.msra.mxu2 %v412_v17  ;;  %v472_v36 = vor.u32 %v514_v31, %v471_v29  ;;  %v509_v37 = vld [vmem:[#allocation7 + $0xc4] sm:$0xf]  ;;  %v399_v39 = vld [vmem:[#allocation7 + $0x50] sm:$0xf] }
  0x14   :  { %297 = vmatpush.bf16.msra.mxu3 %v476_v18  ;;  %v457_v38 = vld [vmem:[#allocation7 + $0xc8] sm:$0xf0]  ;;  %v496_v40 = vld [vmem:[#allocation7 + $0x54] sm:$0xf0]  ;;  %v463_v41 = vld [vmem:[#allocation7 + $0xd0] sm:$0xf]  ;;  %v396_v47 = vor.u32 %v493_v32, %v393_v33 }
  0x15   :  { %v512_v42 = vld [vmem:[#allocation7 + $0xd4] sm:$0xf0]  ;;  %v400_v43 = vor.u32 %v496_v40, %v399_v39  ;;  %v391_v45 = vld [vmem:[#allocation7 + $0x40] sm:$0xf]  ;;  %v494_v46 = vld [vmem:[#allocation7 + $0x44] sm:$0xf0]  ;;  %v460_v48 = vor.u32 %v509_v37, %v457_v38 }
  0x16   :  { %258 = vmatpush.bf16.msra.mxu0 %v408_v30  ;;  %v464_v44 = vor.u32 %v512_v42, %v463_v41  ;;  %v491_v49 = vld [vmem:[#allocation7 + $0x34] sm:$0xf]  ;;  %v455_v50 = vld [vmem:[#allocation7 + $0xc0] sm:$0xf]  ;;  %v510_v51 = vld [vmem:[#allocation7 + $0xc4] sm:$0xf0]  ;;  %v392_v55 = vor.u32 %v494_v46, %v391_v45 }
  0x17   :  { %271 = vmatpush.bf16.msra.mxu1 %v472_v36  ;;  %285 = vmatpush.bf16.msra.mxu2 %v404_v34  ;;  %v385_v52 = vld [vmem:[#allocation7 + $0x38] sm:$0xf0]  ;;  %v507_v53 = vld [vmem:[#allocation7 + $0xb4] sm:$0xf]  ;;  %v456_v56 = vor.u32 %v510_v51, %v455_v50  ;;  %v383_v57 = vld [vmem:[#allocation7 + $0x30] sm:$0xf]  ;;  %v63_v34 = vpack.c.bf16 %v633_v0, %v633_v0 }
  0x18   :  { %298 = vmatpush.bf16.msra.mxu3 %v468_v35  ;;  %v449_v54 = vld [vmem:[#allocation7 + $0xb8] sm:$0xf0]  ;;  %v492_v58 = vld [vmem:[#allocation7 + $0x34] sm:$0xf0]  ;;  %v388_v59 = vor.u32 %v491_v49, %v385_v52  ;;  %v489_v61 = vld [vmem:[#allocation7 + $0x24] sm:$0xf]  ;;  %v64_v35 = vpack.c.bf16 %v635_v1, %v635_v1 }
  0x19   :  { %v452_v60 = vor.u32 %v507_v53, %v449_v54  ;;  %v447_v62 = vld [vmem:[#allocation7 + $0xb0] sm:$0xf]  ;;  %v508_v63 = vld [vmem:[#allocation7 + $0xb4] sm:$0xf0]  ;;  %v377_v2 = vld [vmem:[#allocation7 + $0x28] sm:$0xf0]  ;;  %v384_v5 = vor.u32 %v492_v58, %v383_v57 }
  0x1a   :  { %259 = vmatpush.bf16.msra.mxu0 %v400_v43  ;;  %v505_v3 = vld [vmem:[#allocation7 + $0xa4] sm:$0xf]  ;;  %v441_v4 = vld [vmem:[#allocation7 + $0xa8] sm:$0xf0]  ;;  %v448_v6 = vor.u32 %v508_v63, %v447_v62  ;;  %v375_v7 = vld [vmem:[#allocation7 + $0x20] sm:$0xf]  ;;  %v380_v10 = vor.u32 %v489_v61, %v377_v2 }
  0x1b   :  { %272 = vmatpush.bf16.msra.mxu1 %v464_v44  ;;  %286 = vmatpush.bf16.msra.mxu2 %v396_v47  ;;  %v490_v8 = vld [vmem:[#allocation7 + $0x24] sm:$0xf0]  ;;  %v609_v9 = vmov 0.0   ;;  %v444_v11 = vor.u32 %v505_v3, %v441_v4  ;;  %v487_v12 = vld [vmem:[#allocation7 + $0x14] sm:$0xf]  ;;  %v610_v42 = vmov 0  }
  0x1c   :  { %299 = vmatpush.bf16.msra.mxu3 %v460_v48  ;;  %49 = vst.msk [vmem:[#allocation3] sm:$0xff] %vm48_vm0, %v609_v9  ;;  %v439_v13 = vld [vmem:[#allocation7 + $0xa0] sm:$0xf]  ;;  %v506_v14 = vld [vmem:[#allocation7 + $0xa4] sm:$0xf0]  ;;  %v376_v18 = vor.u32 %v490_v8, %v375_v7  ;;  %524 = vset.pattern.permute.xlu0 %v610_v42  ;;  %s344_s1 = sshll.u32 %s611_s0, 4  ;;  %s345_s1 = int_to_ptr.vmem [resolvable:$true] %s344_s1 }
  0x1d   :  { %v369_v15 = vld [vmem:[#allocation7 + $0x18] sm:$0xf0]  ;;  %v503_v16 = vld [vmem:[#allocation7 + $0x94] sm:$0xf]  ;;  %v440_v19 = vor.u32 %v506_v14, %v439_v13  ;;  %v485_v22 = vld [vmem:[#allocation7 + $0x4] sm:$0xf] }
  0x1e   :  { %260 = vmatpush.bf16.msra.mxu0 %v392_v55  ;;  %v433_v17 = vld [vmem:[#allocation7 + $0x98] sm:$0xf0]  ;;  %v372_v20 = vor.u32 %v487_v12, %v369_v15  ;;  %v361_v23 = vld [vmem:[#allocation7 + $0x8] sm:$0xf0]  ;;  %v501_v24 = vld [vmem:[#allocation7 + $0x84] sm:$0xf] }
  0x1f   :  { %273 = vmatpush.bf16.msra.mxu1 %v456_v56  ;;  %287 = vmatpush.bf16.msra.mxu2 %v388_v59  ;;  %v436_v21 = vor.u32 %v503_v16, %v433_v17  ;;  %v425_v25 = vld [vmem:[#allocation7 + $0x88] sm:$0xf0]  ;;  %v364_v26 = vor.u32 %v485_v22, %v361_v23  ;;  %v367_v28 = vld [vmem:[#allocation7 + $0x10] sm:$0xf]  ;;  %v488_v29 = vld [vmem:[#allocation7 + $0x14] sm:$0xf0] }
  0x20   :  { %300 = vmatpush.bf16.msra.mxu3 %v452_v60  ;;  %v428_v27 = vor.u32 %v501_v24, %v425_v25  ;;  %v431_v30 = vld [vmem:[#allocation7 + $0x90] sm:$0xf]  ;;  %v368_v31 = vor.u32 %v488_v29, %v367_v28  ;;  %v504_v32 = vld [vmem:[#allocation7 + $0x94] sm:$0xf0]  ;;  %v359_v36 = vld [vmem:[#allocation7] sm:$0xf] }
  0x21   :  { %v432_v33 = vor.u32 %v504_v32, %v431_v30  ;;  %v486_v37 = vld [vmem:[#allocation7 + $0x4] sm:$0xf0]  ;;  %v423_v38 = vld [vmem:[#allocation7 + $0x80] sm:$0xf]  ;;  %s346_s23 = sshll.u32 %s652_s2, 4  ;;  %s347_s23 = int_to_ptr.hbm [resolvable:$true] %s346_s23 }
  0x22   :  { %261 = vmatpush.bf16.msra.mxu0 %v384_v5  ;;  %v360_v39 = vor.u32 %v486_v37, %v359_v36  ;;  %v502_v40 = vld [vmem:[#allocation7 + $0x84] sm:$0xf0] }
  0x23   :  { %274 = vmatpush.bf16.msra.mxu1 %v448_v6  ;;  %288 = vmatpush.bf16.msra.mxu2 %v380_v10  ;;  %v424_v41 = vor.u32 %v502_v40, %v423_v38  ;;  %v52_v0 = vld [vmem:[#allocation3] sm:$0xff] }
  0x24   :  { %301 = vmatpush.bf16.msra.mxu3 %v444_v11 }
  0x26   :  { %262 = vmatpush.bf16.msra.mxu0 %v376_v18 }
  0x27   :  { %275 = vmatpush.bf16.msra.mxu1 %v440_v19  ;;  %289 = vmatpush.bf16.msra.mxu2 %v372_v20 }
  0x28   :  { %302 = vmatpush.bf16.msra.mxu3 %v436_v21 }
  0x2a   :  { %263 = vmatpush.bf16.msra.mxu0 %v368_v31 }
  0x2b   :  { %290 = vmatpush.bf16.msra.mxu2 %v364_v26  ;;  %276 = vmatpush.bf16.msra.mxu1 %v432_v33 }
  0x2c   :  { %303 = vmatpush.bf16.msra.mxu3 %v428_v27 }
  0x2e   :  { %291 = vmatmul.bf16.vlgmr.msra.gmra.mxu2 %v63_v34  ;;  %264 = vmatpush.bf16.msra.mxu0 %v360_v39 }
  0x2f   :  { %304 = vmatmul.bf16.vlgmr.msra.gmra.mxu3 %v64_v35  ;;  %277 = vmatpush.bf16.msra.mxu1 %v424_v41 }
  0x31   :  { %265 = vmatmul.bf16.vlgmr.msra.gmra.mxu0 %v63_v34 }
  0x32   :  { %278 = vmatmul.bf16.vlgmr.msra.gmra.mxu1 %v64_v35 }
  0x83   :  { %v57_v43 = vpop.xlane.xlu0 %56 }
  0x84   :  { %v58_v44 = vadd.f32 %v57_v43, %v52_v0 }
  0x86   :  { %60 = vst.msk [vmem:[#allocation3] sm:$0xff] %vm48_vm0, %v58_v44 }
  0x8d   :  { %v316_v1 = vld [vmem:[#allocation3] sm:$0xff] }
  0x8e   :  { %v317_v45 = vmax.f32 %v316_v1, 1e-24 }
  0x90   :  { %525 = vrsqrt.f32 %v317_v45  ;;  %vm324_vm2 = vweird.f32 %v317_v45 }
  0x96   :  { %v526_v46 = vpop.eup %525 }
  0x97   :  { %v319_v47 = vmul.f32 %v526_v46, %v317_v45  ;;  %vm325_vm1 = vweird.f32 %v526_v46 }
  0x98   :  { %vm326_vm3 = vmor %vm324_vm2, %vm325_vm1 }
  0x99   :  { %v320_v48 = vmul.f32 %v526_v46, %v319_v47 }
  0x9b   :  { %v321_v49 = vmul.f32 0.5, %v320_v48 }
  0x9d   :  { %v322_v50 = vsub.f32 1.5, %v321_v49 }
  0x9f   :  { %v323_v51 = vmul.f32 %v526_v46, %v322_v50 }
  0xa1   :  { %v327_v52 = vsel %vm326_vm3, %v526_v46, %v323_v51 }
  0xa2   :  { %332 = vperm.xlu0 %524, %v327_v52  }
  0xae   :  { %v266_v53 = vpop.f32.mrf.mxu0 }
  0xaf   :  { %v279_v55 = vpop.f32.mrf.mxu1 }
  0xb0   :  { %v280_v61 = vadd.f32 %v279_v55, %v266_v53 }
  0xb1   :  { %v292_v54 = vpop.f32.mrf.mxu2 }
  0xb2   :  { %v305_v56 = vpop.f32.mrf.mxu3 }
  0xb3   :  { %v306_v62 = vadd.f32 %v305_v56, %v292_v54 }
  0xb6   :  { %v268_v57 = vpop.f32.mrf.mxu0 }
  0xb7   :  { %v281_v59 = vpop.f32.mrf.mxu1 }
  0xb9   :  { %v294_v58 = vpop.f32.mrf.mxu2 }
  0xba   :  { %v307_v60 = vpop.f32.mrf.mxu3 }
 0x114   :  { %v333_v63 = vpop.permute.xlu0 %332 }
 0x115   :  { %v335_v2 = vmul.f32 %v333_v63, %v280_v61  ;;  %v336_v3 = vmul.f32 %v333_v63, %v306_v62 }
 0x117   :  { %337 = vst [vmem:[#allocation9] sm:$0xff] %v335_v2 }
 0x118   :  { %338 = vst [vmem:[#allocation9 + $0x8] sm:$0xff] %v336_v3 }
 0x119   :  { %349 = dma.vmem_to_hbm [thread:$0]  %s345_s1, 256, %s347_s23, [#allocation6]  }
 0x11a   :  { %603 = dma.done.wait [#allocation6], 256  }
 0x11b   :  { %604 = vsyncadd [#allocation6], 4294967040 }
 0x11c   :  { %354 = vsyncpa [#allocation5], 1 }
 0x11d   :  { %355 = vsyncpa [#allocation8], 1 }
 0x11e   :  { %356 = vsyncpa [#allocation6], 1 }

</bundles_post_ra>
